<compile_context>
chip_gen: v5e
topology: v5e:2x2
jax: 0.10.0
libtpu: 0.0.40
codegen_flags: <defaults>
</compile_context>

<pallas_src>
import functools
import math

import jax
import jax.numpy as jnp
from jax import lax
from jax.experimental import pallas as pl
from jax.experimental.pallas import tpu as pltpu

_MIB = 1024 * 1024


# ----------------------------------------------------------------------------
# Kernel: one grid step == one (query-tile, head-block) pair.
# ----------------------------------------------------------------------------
def _mha_kernel(q_ref, k_ref, v_ref, mask_ref, ctx_ref, attn_ref, *,
                head_dim, h_blk, use_bf16_exp):
    """
    q_ref    : (TQ, bw)        bf16  pre-projected, pre-scaled query tile
    k_ref    : (N,  bw)        bf16  pre-projected key columns of this head block
    v_ref    : (N,  bw)        bf16  pre-projected value columns of this head block
    mask_ref : (TQ, N)         int8  1 where masked, 0 otherwise
    ctx_ref  : (TQ, bw)        f32   context output slab
    attn_ref : (h_blk, TQ, N)  bf16  attention-probability output slab
    """
    masked = mask_ref[...] != 0                              # (TQ, N) bool, reused
    q = q_ref[...]                                           # (TQ, bw) bf16

    for h in range(h_blk):                                   # small, static unroll
        lo = h * head_dim
        hi = lo + head_dim
        qh = q[:, lo:hi]                                     # (TQ, hd) bf16
        kh = k_ref[:, lo:hi]                                 # (N,  hd) bf16
        vh = v_ref[:, lo:hi]                                 # (N,  hd) bf16

        # scores = q_h @ k_h^T  (contract on head_dim, no explicit transpose)
        scores = lax.dot_general(
            qh, kh, dimension_numbers=(((1,), (1,)), ((), ())),
            preferred_element_type=jnp.float32)              # (TQ, N) f32
        scores = jnp.where(masked, jnp.float32(-1e9), scores)

        # softmax over keys (max-subtracted); exponent in bf16 where the EUP
        # has a bf16 path (v6e/v7x), f32 on v5e; reciprocal on the EUP.
        m = jnp.max(scores, axis=-1, keepdims=True)
        centered = scores - m
        if use_bf16_exp:
            e = jnp.exp(centered.astype(jnp.bfloat16))       # bf16 EUP exp
            denom = jnp.sum(e, axis=-1, keepdims=True, dtype=jnp.float32)
            attn_bf = e * pl.reciprocal(denom, approx=True).astype(jnp.bfloat16)
        else:
            e = jnp.exp(centered)                            # f32 exp (v5e path)
            denom = jnp.sum(e, axis=-1, keepdims=True)
            attn_bf = (e * pl.reciprocal(denom, approx=True)).astype(jnp.bfloat16)

        # Single bf16 cast reused for both the store and the attn @ V matmul.
        attn_ref[h] = attn_bf.astype(attn_ref.dtype)
        ctx_ref[:, lo:hi] = jnp.dot(
            attn_bf, vh, preferred_element_type=jnp.float32).astype(ctx_ref.dtype)


# ----------------------------------------------------------------------------
# Per-generation VMEM budget / tile selection.
# ----------------------------------------------------------------------------
def _vmem_budget():
    """Returns (usable per-step budget, physical VMEM capacity) in bytes."""
    cap = None
    try:
        cap = int(pltpu.get_tpu_info().vmem_capacity_bytes)
    except Exception:
        cap = None
    if not cap:
        try:
            kind = jax.devices()[0].device_kind.lower()
            if "v2" in kind or "v3" in kind:
                cap = 16 * _MIB
            elif "v7" in kind:
                cap = 64 * _MIB
            else:
                cap = 128 * _MIB          # v4 / v5e / v5p / v6e
        except Exception:
            cap = 64 * _MIB               # conservative: fits every generation
    # Headroom for Mosaic internal scratch / regalloc / semaphores.
    budget = max(min(cap - 16 * _MIB, int(0.8 * cap)), cap // 2)
    return budget, cap


def _eup_has_bf16():
    """bf16 exp only where the EUP has a bf16 path (v6e / v7x and newer)."""
    try:
        kind = jax.devices()[0].device_kind.lower()
    except Exception:
        return False
    return not any(v in kind for v in ("v2", "v3", "v4", "v5"))


def _vmem_estimate(n_keys, tq, h_blk, head_dim, attn_bytes):
    """Per-grid-step VMEM footprint: double-buffered blocks + live temporaries."""
    bw = h_blk * head_dim
    per_buf = (tq * bw * 2                      # Q tile (bf16)
               + 2 * n_keys * bw * 2            # K + V column blocks (bf16)
               + tq * n_keys                    # mask (int8)
               + tq * bw * 4                    # ctx out block (f32)
               + h_blk * tq * n_keys * attn_bytes)  # attn out block
    temps = 3 * tq * n_keys * 4 + 2 * _MIB      # scores/exp/attn live per head + slack
    return 2 * per_buf + temps                  # BlockSpec double-buffers each block


def _head_block_candidates(num_heads, head_dim, edim):
    """Head-group sizes whose column width is 128-lane aligned (or full edim)."""
    out = []
    for hb in range(1, num_heads + 1):
        if num_heads % hb:
            continue
        bw = hb * head_dim
        if bw % 128 == 0 or bw == edim:
            out.append(hb)
    return out                                   # hb == num_heads is always valid


def _q_tile_candidates(n_q, max_tq=1024):
    """(tq, padded_n_q) candidates, largest useful tiles first."""
    cands = []
    if n_q <= max_tq:
        cands.append((n_q, n_q))                 # single full-N tile
    t = (min(n_q, max_tq) // 8) * 8
    while t >= 8:                                # 8-aligned divisors of N
        if n_q % t == 0:
            cands.append((t, n_q))
        t -= 8
    for t in (1024, 512, 256, 128, 64, 32, 16, 8):   # padded fallbacks
        if t <= max_tq and t < n_q:
            cands.append((t, -(-n_q // t) * t))
    seen, out = set(), []
    for c in cands:
        if c not in seen:
            seen.add(c)
            out.append(c)
    return out


def _select_tiles(n_q, n_keys, edim, num_heads, head_dim, budget, attn_dtype):
    """Pick (tq, h_blk, padded_n_q, vmem_estimate): minimize modeled HBM traffic
    subject to the per-step VMEM budget."""
    attn_bytes = jnp.dtype(attn_dtype).itemsize
    step_overhead_bytes = 512 * 1024             # ~0.35us/step expressed as bytes
    best = None
    for hb in _head_block_candidates(num_heads, head_dim, edim):
        n_hb = num_heads // hb
        for tq, nq_pad in _q_tile_candidates(n_q):
            est = _vmem_estimate(n_keys, tq, hb, head_dim, attn_bytes)
            if est > budget:
                continue
            n_qt = nq_pad // tq
            # HBM traffic model for grid = (q-tile outer, head-block inner):
            # K/V column blocks cycle with the inner axis, so they are re-read
            # once per q-tile unless there is a single head block.
            kv_reads = (n_qt if n_hb > 1 else 1) * 2 * n_keys * edim * 2
            traffic = (nq_pad * edim * 2                              # Q tiles
                       + kv_reads                                     # K/V reads
                       + nq_pad * n_keys                              # int8 mask
                       + nq_pad * edim * 4                            # ctx writeback
                       + num_heads * nq_pad * n_keys * attn_bytes     # attn writeback
                       + n_qt * n_hb * step_overhead_bytes)           # step overhead
            key = (traffic, -min(tq, n_q), est)
            if best is None or key < best[0]:
                best = (key, (tq, hb, nq_pad, est))
    if best is None:
        # Nothing fits the budget (extremely long sequences).  Fall back to the
        # smallest configuration and let vmem_limit stretch toward capacity.
        # TODO(synk): tile the key axis with an online softmax for this case.
        hb = min(_head_block_candidates(num_heads, head_dim, edim))
        tq, nq_pad = _q_tile_candidates(n_q)[-1]
        return tq, hb, nq_pad, _vmem_estimate(n_keys, tq, hb, head_dim, attn_bytes)
    return best[1]


# ----------------------------------------------------------------------------
# Wrapper.
# ----------------------------------------------------------------------------
def multi_head_attention(input_Q, input_K, input_V, W_Q, W_V, num_heads,
                         attn_mask=None, attn_dtype=jnp.bfloat16):
    """Pallas implementation of MultiHeadAttention.forward.

    input_Q: (N, qdim), input_K: (N, kdim), input_V: (N, vdim)
    W_Q: (edim, qdim), W_V: (edim, vdim)   (torch.nn.Linear weight layout)
    attn_mask: (N, N) bool or None
    Returns: context (N, edim) f32, attn (num_heads, N, N) `attn_dtype`.
    """
    N, _ = input_Q.shape
    edim = W_Q.shape[0]
    head_dim = edim // num_heads
    assert head_dim * num_heads == edim

    if attn_mask is None:
        attn_mask = jnp.zeros((N, N), dtype=bool)
    mask_i8 = attn_mask.astype(jnp.int8)          # 4x fewer HBM bytes than f32

    # --- projections hoisted out of the kernel (one XLA matmul each) --------
    # Module quirk (faithful): K is projected with W_Q, not W_K.  The 1/sqrt(hd)
    # softmax scale is folded into the (tiny) Q-projection weights only.
    scale = 1.0 / math.sqrt(float(head_dim))
    wq_t = W_Q.T.astype(jnp.bfloat16)                     # (qdim, edim)
    wq_t_scaled = (W_Q.T * scale).astype(jnp.bfloat16)
    wv_t = W_V.T.astype(jnp.bfloat16)                     # (vdim, edim)
    q_proj = jnp.dot(input_Q.astype(jnp.bfloat16), wq_t_scaled,
                     preferred_element_type=jnp.float32).astype(jnp.bfloat16)
    k_proj = jnp.dot(input_K.astype(jnp.bfloat16), wq_t,
                     preferred_element_type=jnp.float32).astype(jnp.bfloat16)
    v_proj = jnp.dot(input_V.astype(jnp.bfloat16), wv_t,
                     preferred_element_type=jnp.float32).astype(jnp.bfloat16)

    # --- per-generation tiling & VMEM limit ----------------------------------
    budget, vmem_cap = _vmem_budget()
    use_bf16_exp = _eup_has_bf16()
    tq, h_blk, nq_pad, est = _select_tiles(
        N, N, edim, num_heads, head_dim, budget, attn_dtype)
    bw = h_blk * head_dim
    n_hb = num_heads // h_blk
    n_qt = nq_pad // tq

    if nq_pad != N:                               # pad query axis only; sliced below
        pad = nq_pad - N
        q_proj = jnp.pad(q_proj, ((0, pad), (0, 0)))
        mask_i8 = jnp.pad(mask_i8, ((0, pad), (0, 0)))

    vmem_limit = int(min(vmem_cap, max(est + (8 << 20), 32 << 20)))

    kernel = functools.partial(_mha_kernel, head_dim=head_dim, h_blk=h_blk,
                               use_bf16_exp=use_bf16_exp)

    # TODO(synk): add a context-only variant (skip the attn output entirely)
    # for callers that do not consume the attention probabilities.
    context, attn = pl.pallas_call(
        kernel,
        out_shape=(
            jax.ShapeDtypeStruct((nq_pad, edim), jnp.float32),       # context
            jax.ShapeDtypeStruct((num_heads, nq_pad, N), attn_dtype),  # attn
        ),
        grid_spec=pltpu.PrefetchScalarGridSpec(
            num_scalar_prefetch=0,
            grid=(n_qt, n_hb),                   # q-tile outer, head-block inner
            in_specs=[
                pl.BlockSpec((tq, bw), lambda qi, hb: (qi, hb)),     # Q proj tile
                pl.BlockSpec((N, bw), lambda qi, hb: (0, hb)),       # K proj cols
                pl.BlockSpec((N, bw), lambda qi, hb: (0, hb)),       # V proj cols
                pl.BlockSpec((tq, N), lambda qi, hb: (qi, 0)),       # int8 mask
            ],
            out_specs=[
                pl.BlockSpec((tq, bw), lambda qi, hb: (qi, hb)),           # ctx
                pl.BlockSpec((h_blk, tq, N), lambda qi, hb: (hb, qi, 0)),  # attn
            ],
        ),
        compiler_params=pltpu.CompilerParams(
            dimension_semantics=("parallel", "parallel"),
            vmem_limit_bytes=vmem_limit,
        ),
    )(q_proj, k_proj, v_proj, mask_i8)

    if nq_pad != N:
        context = context[:N]
        attn = attn[:, :N, :]
    return context, attn


# ----------------------------------------------------------------------------
# Pure-JAX f32 reference mirroring the PyTorch module.
# ----------------------------------------------------------------------------
def _reference(input_Q, input_K, input_V, W_Q, W_V, num_heads, attn_mask):
    N = input_Q.shape[0]
    edim = W_Q.shape[0]
    head_dim = edim // num_heads
    Q = (input_Q @ W_Q.T).reshape(N, num_heads, head_dim).transpose(1, 0, 2)
    K = (input_K @ W_Q.T).reshape(N, num_heads, head_dim).transpose(1, 0, 2)
    V = (input_V @ W_V.T).reshape(N, num_heads, head_dim).transpose(1, 0, 2)
    scores = jnp.einsum("hnd,hmd->hnm", Q, K) / jnp.sqrt(jnp.float32(head_dim))
    scores = jnp.where(attn_mask[None, :, :], -1e9, scores)
    attn = jax.nn.softmax(scores, axis=-1)
    ctx = jnp.einsum("hnm,hmd->hnd", attn, V)
    context = ctx.transpose(1, 0, 2).reshape(N, edim)
    return context, attn


if __name__ == "__main__":
    def run_case(N, edim, num_heads, seed):
        qdim = kdim = vdim = edim
        key = jax.random.PRNGKey(seed)
        k1, k2, k3, k4, k5, k6 = jax.random.split(key, 6)
        input_Q = jax.random.normal(k1, (N, qdim), dtype=jnp.float32)
        input_K = jax.random.normal(k2, (N, kdim), dtype=jnp.float32)
        input_V = jax.random.normal(k3, (N, vdim), dtype=jnp.float32)
        w_scale = 1.0 / math.sqrt(float(qdim))
        W_Q = jax.random.normal(k4, (edim, qdim), dtype=jnp.float32) * w_scale
        W_V = jax.random.normal(k5, (edim, vdim), dtype=jnp.float32) * w_scale
        attn_mask = jax.random.bernoulli(k6, p=0.2, shape=(N, N))

        context, attn = multi_head_attention(
            input_Q, input_K, input_V, W_Q, W_V, num_heads, attn_mask)
        jax.block_until_ready((context, attn))

        ref_ctx, ref_attn = _reference(
            input_Q, input_K, input_V, W_Q, W_V, num_heads, attn_mask)
        assert context.shape == (N, edim)
        assert attn.shape == (num_heads, N, N)
        # bf16 projections + bf16 attn output (+ bf16 exp on v6e/v7x): compare
        # at bf16-level tolerance.
        assert jnp.allclose(context.astype(jnp.float32), ref_ctx,
                            atol=3e-2, rtol=3e-2), "ctx mismatch"
        assert jnp.allclose(attn.astype(jnp.float32), ref_attn,
                            atol=3e-2, rtol=3e-2), "attn mismatch"

    # Module-default small config: N=8, edim=32, 4 heads (head_dim=8).
    run_case(N=8, edim=32, num_heads=4, seed=0)
    # Larger heads: head_dim=128 -> lane-aligned head blocks.
    run_case(N=32, edim=512, num_heads=4, seed=1)
    # Awkward sequence length (N not a multiple of 8).
    run_case(N=12, edim=32, num_heads=4, seed=2)

    print("KERNEL_OK")
</pallas_src>

<mosaic_0001>
module attributes {stable_mosaic.version = 11 : i64} {
  func.func @_mha_kernel(%arg0: i32, %arg1: i32, %arg2: memref<8x32xbf16, #tpu.memory_space<vmem>>, %arg3: memref<8x32xbf16, #tpu.memory_space<vmem>>, %arg4: memref<8x32xbf16, #tpu.memory_space<vmem>>, %arg5: memref<8x8xi8, #tpu.memory_space<vmem>>, %arg6: memref<8x32xf32, #tpu.memory_space<vmem>>, %arg7: memref<4x8x8xbf16, #tpu.memory_space<vmem>>) attributes {dimension_semantics = [#tpu.dimension_semantics<parallel>, #tpu.dimension_semantics<parallel>], iteration_bounds = array<i64: 1, 1>, scalar_prefetch = 0 : i64, scratch_operands = 0 : i64, tpu.core_type = #tpu.core_type<tc>, window_params = [{transform_indices = @transform_0, window_bounds = array<i64: 8, 32>}, {transform_indices = @transform_1, window_bounds = array<i64: 8, 32>}, {transform_indices = @transform_2, window_bounds = array<i64: 8, 32>}, {transform_indices = @transform_3, window_bounds = array<i64: 8, 8>}, {transform_indices = @transform_4, window_bounds = array<i64: 8, 32>}, {transform_indices = @transform_5, window_bounds = array<i64: 4, 8, 8>}]} {
    %c0 = arith.constant 0 : index
    %c0_0 = arith.constant 0 : index
    %0 = vector.load %arg5[%c0, %c0_0] : memref<8x8xi8, #tpu.memory_space<vmem>>, vector<8x8xi8>
    %c0_i8 = arith.constant 0 : i8
    %1 = vector.broadcast %c0_i8 : i8 to vector<8x8xi8>
    %2 = arith.cmpi ne, %0, %1 : vector<8x8xi8>
    %c0_1 = arith.constant 0 : index
    %c0_2 = arith.constant 0 : index
    %3 = vector.load %arg2[%c0_1, %c0_2] : memref<8x32xbf16, #tpu.memory_space<vmem>>, vector<8x32xbf16>
    %4 = vector.extract_strided_slice %3 {offsets = [0, 0], sizes = [8, 8], strides = [1, 1]} : vector<8x32xbf16> to vector<8x8xbf16>
    %c0_3 = arith.constant 0 : index
    %c0_4 = arith.constant 0 : index
    %5 = vector.load %arg3[%c0_3, %c0_4] : memref<8x32xbf16, #tpu.memory_space<vmem>>, vector<8x8xbf16>
    %c0_5 = arith.constant 0 : index
    %c0_6 = arith.constant 0 : index
    %6 = vector.load %arg4[%c0_5, %c0_6] : memref<8x32xbf16, #tpu.memory_space<vmem>>, vector<8x8xbf16>
    %cst = arith.constant dense<0.000000e+00> : vector<8x8xf32>
    %7 = tpu.matmul %4, %5, %cst {dimension_numbers = #tpu.dot_dimension_numbers<[1], [1], [0], [0], [0, 0, 1, 0], [], []>} : vector<8x8xbf16>, vector<8x8xbf16>, vector<8x8xf32> -> vector<8x8xf32>
    %cst_7 = arith.constant -1.000000e+09 : f32
    %8 = vector.broadcast %cst_7 : f32 to vector<8x8xf32>
    %9 = arith.select %2, %8, %7 : vector<8x8xi1>, vector<8x8xf32>
    %cst_8 = arith.constant dense<0xFF800000> : vector<8xf32>
    %10 = vector.multi_reduction <maximumf>, %9, %cst_8 [1] : vector<8x8xf32> to vector<8xf32>
    %11 = vector.shape_cast %10 : vector<8xf32> to vector<8x1xf32>
    %12 = vector.broadcast %11 : vector<8x1xf32> to vector<8x8xf32>
    %13 = arith.subf %9, %12 : vector<8x8xf32>
    %14 = arith.truncf %13 : vector<8x8xf32> to vector<8x8xbf16>
    %15 = math.exp %14 : vector<8x8xbf16>
    %16 = arith.extf %15 : vector<8x8xbf16> to vector<8x8xf32>
    %cst_9 = arith.constant dense<0.000000e+00> : vector<8xf32>
    %17 = vector.multi_reduction <add>, %16, %cst_9 [1] : vector<8x8xf32> to vector<8xf32>
    %18 = vector.shape_cast %17 : vector<8xf32> to vector<8x1xf32>
    %19 = tpu.reciprocal %18 {approx = true} : vector<8x1xf32> -> vector<8x1xf32>
    %20 = arith.truncf %19 : vector<8x1xf32> to vector<8x1xbf16>
    %21 = vector.broadcast %20 : vector<8x1xbf16> to vector<8x8xbf16>
    %22 = arith.mulf %15, %21 : vector<8x8xbf16>
    %c0_10 = arith.constant 0 : index
    %c0_11 = arith.constant 0 : index
    %c0_12 = arith.constant 0 : index
    %23 = vector.load %arg7[%c0_10, %c0_11, %c0_12] : memref<4x8x8xbf16, #tpu.memory_space<vmem>>, vector<1x8x8xbf16>
    %24 = vector.shape_cast %23 : vector<1x8x8xbf16> to vector<8x8xbf16>
    %25 = vector.shape_cast %22 : vector<8x8xbf16> to vector<1x8x8xbf16>
    tpu.vector_store %arg7[%c0_10, %c0_11, %c0_12], %25 {strides = array<i32>} : memref<4x8x8xbf16, #tpu.memory_space<vmem>>, vector<1x8x8xbf16>,
    %cst_13 = arith.constant dense<0.000000e+00> : vector<8x8xf32>
    %26 = tpu.matmul %22, %6, %cst_13 {dimension_numbers = #tpu.dot_dimension_numbers<[1], [0], [0], [1], [0, 0, 1, 1], [], []>} : vector<8x8xbf16>, vector<8x8xbf16>, vector<8x8xf32> -> vector<8x8xf32>
    %c0_14 = arith.constant 0 : index
    %c0_15 = arith.constant 0 : index
    %27 = vector.load %arg6[%c0_14, %c0_15] : memref<8x32xf32, #tpu.memory_space<vmem>>, vector<8x8xf32>
    tpu.vector_store %arg6[%c0_14, %c0_15], %26 {strides = array<i32>} : memref<8x32xf32, #tpu.memory_space<vmem>>, vector<8x8xf32>,
    %28 = vector.extract_strided_slice %3 {offsets = [0, 8], sizes = [8, 8], strides = [1, 1]} : vector<8x32xbf16> to vector<8x8xbf16>
    %c0_16 = arith.constant 0 : index
    %c8 = arith.constant 8 : index
    %29 = vector.load %arg3[%c0_16, %c8] : memref<8x32xbf16, #tpu.memory_space<vmem>>, vector<8x8xbf16>
    %c0_17 = arith.constant 0 : index
    %c8_18 = arith.constant 8 : index
    %30 = vector.load %arg4[%c0_17, %c8_18] : memref<8x32xbf16, #tpu.memory_space<vmem>>, vector<8x8xbf16>
    %cst_19 = arith.constant dense<0.000000e+00> : vector<8x8xf32>
    %31 = tpu.matmul %28, %29, %cst_19 {dimension_numbers = #tpu.dot_dimension_numbers<[1], [1], [0], [0], [0, 0, 1, 0], [], []>} : vector<8x8xbf16>, vector<8x8xbf16>, vector<8x8xf32> -> vector<8x8xf32>
    %cst_20 = arith.constant -1.000000e+09 : f32
    %32 = vector.broadcast %cst_20 : f32 to vector<8x8xf32>
    %33 = arith.select %2, %32, %31 : vector<8x8xi1>, vector<8x8xf32>
    %cst_21 = arith.constant dense<0xFF800000> : vector<8xf32>
    %34 = vector.multi_reduction <maximumf>, %33, %cst_21 [1] : vector<8x8xf32> to vector<8xf32>
    %35 = vector.shape_cast %34 : vector<8xf32> to vector<8x1xf32>
    %36 = vector.broadcast %35 : vector<8x1xf32> to vector<8x8xf32>
    %37 = arith.subf %33, %36 : vector<8x8xf32>
    %38 = arith.truncf %37 : vector<8x8xf32> to vector<8x8xbf16>
    %39 = math.exp %38 : vector<8x8xbf16>
    %40 = arith.extf %39 : vector<8x8xbf16> to vector<8x8xf32>
    %cst_22 = arith.constant dense<0.000000e+00> : vector<8xf32>
    %41 = vector.multi_reduction <add>, %40, %cst_22 [1] : vector<8x8xf32> to vector<8xf32>
    %42 = vector.shape_cast %41 : vector<8xf32> to vector<8x1xf32>
    %43 = tpu.reciprocal %42 {approx = true} : vector<8x1xf32> -> vector<8x1xf32>
    %44 = arith.truncf %43 : vector<8x1xf32> to vector<8x1xbf16>
    %45 = vector.broadcast %44 : vector<8x1xbf16> to vector<8x8xbf16>
    %46 = arith.mulf %39, %45 : vector<8x8xbf16>
    %c1 = arith.constant 1 : index
    %c0_23 = arith.constant 0 : index
    %c0_24 = arith.constant 0 : index
    %47 = vector.load %arg7[%c1, %c0_23, %c0_24] : memref<4x8x8xbf16, #tpu.memory_space<vmem>>, vector<1x8x8xbf16>
    %48 = vector.shape_cast %47 : vector<1x8x8xbf16> to vector<8x8xbf16>
    %49 = vector.shape_cast %46 : vector<8x8xbf16> to vector<1x8x8xbf16>
    tpu.vector_store %arg7[%c1, %c0_23, %c0_24], %49 {strides = array<i32>} : memref<4x8x8xbf16, #tpu.memory_space<vmem>>, vector<1x8x8xbf16>,
    %cst_25 = arith.constant dense<0.000000e+00> : vector<8x8xf32>
    %50 = tpu.matmul %46, %30, %cst_25 {dimension_numbers = #tpu.dot_dimension_numbers<[1], [0], [0], [1], [0, 0, 1, 1], [], []>} : vector<8x8xbf16>, vector<8x8xbf16>, vector<8x8xf32> -> vector<8x8xf32>
    %c0_26 = arith.constant 0 : index
    %c8_27 = arith.constant 8 : index
    %51 = vector.load %arg6[%c0_26, %c8_27] : memref<8x32xf32, #tpu.memory_space<vmem>>, vector<8x8xf32>
    tpu.vector_store %arg6[%c0_26, %c8_27], %50 {strides = array<i32>} : memref<8x32xf32, #tpu.memory_space<vmem>>, vector<8x8xf32>,
    %52 = vector.extract_strided_slice %3 {offsets = [0, 16], sizes = [8, 8], strides = [1, 1]} : vector<8x32xbf16> to vector<8x8xbf16>
    %c0_28 = arith.constant 0 : index
    %c16 = arith.constant 16 : index
    %53 = vector.load %arg3[%c0_28, %c16] : memref<8x32xbf16, #tpu.memory_space<vmem>>, vector<8x8xbf16>
    %c0_29 = arith.constant 0 : index
    %c16_30 = arith.constant 16 : index
    %54 = vector.load %arg4[%c0_29, %c16_30] : memref<8x32xbf16, #tpu.memory_space<vmem>>, vector<8x8xbf16>
    %cst_31 = arith.constant dense<0.000000e+00> : vector<8x8xf32>
    %55 = tpu.matmul %52, %53, %cst_31 {dimension_numbers = #tpu.dot_dimension_numbers<[1], [1], [0], [0], [0, 0, 1, 0], [], []>} : vector<8x8xbf16>, vector<8x8xbf16>, vector<8x8xf32> -> vector<8x8xf32>
    %cst_32 = arith.constant -1.000000e+09 : f32
    %56 = vector.broadcast %cst_32 : f32 to vector<8x8xf32>
    %57 = arith.select %2, %56, %55 : vector<8x8xi1>, vector<8x8xf32>
    %cst_33 = arith.constant dense<0xFF800000> : vector<8xf32>
    %58 = vector.multi_reduction <maximumf>, %57, %cst_33 [1] : vector<8x8xf32> to vector<8xf32>
    %59 = vector.shape_cast %58 : vector<8xf32> to vector<8x1xf32>
    %60 = vector.broadcast %59 : vector<8x1xf32> to vector<8x8xf32>
    %61 = arith.subf %57, %60 : vector<8x8xf32>
    %62 = arith.truncf %61 : vector<8x8xf32> to vector<8x8xbf16>
    %63 = math.exp %62 : vector<8x8xbf16>
    %64 = arith.extf %63 : vector<8x8xbf16> to vector<8x8xf32>
    %cst_34 = arith.constant dense<0.000000e+00> : vector<8xf32>
    %65 = vector.multi_reduction <add>, %64, %cst_34 [1] : vector<8x8xf32> to vector<8xf32>
    %66 = vector.shape_cast %65 : vector<8xf32> to vector<8x1xf32>
    %67 = tpu.reciprocal %66 {approx = true} : vector<8x1xf32> -> vector<8x1xf32>
    %68 = arith.truncf %67 : vector<8x1xf32> to vector<8x1xbf16>
    %69 = vector.broadcast %68 : vector<8x1xbf16> to vector<8x8xbf16>
    %70 = arith.mulf %63, %69 : vector<8x8xbf16>
    %c2 = arith.constant 2 : index
    %c0_35 = arith.constant 0 : index
    %c0_36 = arith.constant 0 : index
    %71 = vector.load %arg7[%c2, %c0_35, %c0_36] : memref<4x8x8xbf16, #tpu.memory_space<vmem>>, vector<1x8x8xbf16>
    %72 = vector.shape_cast %71 : vector<1x8x8xbf16> to vector<8x8xbf16>
    %73 = vector.shape_cast %70 : vector<8x8xbf16> to vector<1x8x8xbf16>
    tpu.vector_store %arg7[%c2, %c0_35, %c0_36], %73 {strides = array<i32>} : memref<4x8x8xbf16, #tpu.memory_space<vmem>>, vector<1x8x8xbf16>,
    %cst_37 = arith.constant dense<0.000000e+00> : vector<8x8xf32>
    %74 = tpu.matmul %70, %54, %cst_37 {dimension_numbers = #tpu.dot_dimension_numbers<[1], [0], [0], [1], [0, 0, 1, 1], [], []>} : vector<8x8xbf16>, vector<8x8xbf16>, vector<8x8xf32> -> vector<8x8xf32>
    %c0_38 = arith.constant 0 : index
    %c16_39 = arith.constant 16 : index
    %75 = vector.load %arg6[%c0_38, %c16_39] : memref<8x32xf32, #tpu.memory_space<vmem>>, vector<8x8xf32>
    tpu.vector_store %arg6[%c0_38, %c16_39], %74 {strides = array<i32>} : memref<8x32xf32, #tpu.memory_space<vmem>>, vector<8x8xf32>,
    %76 = vector.extract_strided_slice %3 {offsets = [0, 24], sizes = [8, 8], strides = [1, 1]} : vector<8x32xbf16> to vector<8x8xbf16>
    %c0_40 = arith.constant 0 : index
    %c24 = arith.constant 24 : index
    %77 = vector.load %arg3[%c0_40, %c24] : memref<8x32xbf16, #tpu.memory_space<vmem>>, vector<8x8xbf16>
    %c0_41 = arith.constant 0 : index
    %c24_42 = arith.constant 24 : index
    %78 = vector.load %arg4[%c0_41, %c24_42] : memref<8x32xbf16, #tpu.memory_space<vmem>>, vector<8x8xbf16>
    %cst_43 = arith.constant dense<0.000000e+00> : vector<8x8xf32>
    %79 = tpu.matmul %76, %77, %cst_43 {dimension_numbers = #tpu.dot_dimension_numbers<[1], [1], [0], [0], [0, 0, 1, 0], [], []>} : vector<8x8xbf16>, vector<8x8xbf16>, vector<8x8xf32> -> vector<8x8xf32>
    %cst_44 = arith.constant -1.000000e+09 : f32
    %80 = vector.broadcast %cst_44 : f32 to vector<8x8xf32>
    %81 = arith.select %2, %80, %79 : vector<8x8xi1>, vector<8x8xf32>
    %cst_45 = arith.constant dense<0xFF800000> : vector<8xf32>
    %82 = vector.multi_reduction <maximumf>, %81, %cst_45 [1] : vector<8x8xf32> to vector<8xf32>
    %83 = vector.shape_cast %82 : vector<8xf32> to vector<8x1xf32>
    %84 = vector.broadcast %83 : vector<8x1xf32> to vector<8x8xf32>
    %85 = arith.subf %81, %84 : vector<8x8xf32>
    %86 = arith.truncf %85 : vector<8x8xf32> to vector<8x8xbf16>
    %87 = math.exp %86 : vector<8x8xbf16>
    %88 = arith.extf %87 : vector<8x8xbf16> to vector<8x8xf32>
    %cst_46 = arith.constant dense<0.000000e+00> : vector<8xf32>
    %89 = vector.multi_reduction <add>, %88, %cst_46 [1] : vector<8x8xf32> to vector<8xf32>
    %90 = vector.shape_cast %89 : vector<8xf32> to vector<8x1xf32>
    %91 = tpu.reciprocal %90 {approx = true} : vector<8x1xf32> -> vector<8x1xf32>
    %92 = arith.truncf %91 : vector<8x1xf32> to vector<8x1xbf16>
    %93 = vector.broadcast %92 : vector<8x1xbf16> to vector<8x8xbf16>
    %94 = arith.mulf %87, %93 : vector<8x8xbf16>
    %c3 = arith.constant 3 : index
    %c0_47 = arith.constant 0 : index
    %c0_48 = arith.constant 0 : index
    %95 = vector.load %arg7[%c3, %c0_47, %c0_48] : memref<4x8x8xbf16, #tpu.memory_space<vmem>>, vector<1x8x8xbf16>
    %96 = vector.shape_cast %95 : vector<1x8x8xbf16> to vector<8x8xbf16>
    %97 = vector.shape_cast %94 : vector<8x8xbf16> to vector<1x8x8xbf16>
    tpu.vector_store %arg7[%c3, %c0_47, %c0_48], %97 {strides = array<i32>} : memref<4x8x8xbf16, #tpu.memory_space<vmem>>, vector<1x8x8xbf16>,
    %cst_49 = arith.constant dense<0.000000e+00> : vector<8x8xf32>
    %98 = tpu.matmul %94, %78, %cst_49 {dimension_numbers = #tpu.dot_dimension_numbers<[1], [0], [0], [1], [0, 0, 1, 1], [], []>} : vector<8x8xbf16>, vector<8x8xbf16>, vector<8x8xf32> -> vector<8x8xf32>
    %c0_50 = arith.constant 0 : index
    %c24_51 = arith.constant 24 : index
    %99 = vector.load %arg6[%c0_50, %c24_51] : memref<8x32xf32, #tpu.memory_space<vmem>>, vector<8x8xf32>
    tpu.vector_store %arg6[%c0_50, %c24_51], %98 {strides = array<i32>} : memref<8x32xf32, #tpu.memory_space<vmem>>, vector<8x8xf32>,
    return
  }
  func.func @transform_0(%arg0: i32, %arg1: i32) -> (i32, i32) {
    %c0_i32 = arith.constant 0 : i32
    return %arg0, %arg1 : i32, i32
  }
  func.func @transform_1(%arg0: i32, %arg1: i32) -> (i32, i32) {
    %c0_i32 = arith.constant 0 : i32
    %c0_i32_0 = arith.constant 0 : i32
    return %c0_i32, %arg1 : i32, i32
  }
  func.func @transform_2(%arg0: i32, %arg1: i32) -> (i32, i32) {
    %c0_i32 = arith.constant 0 : i32
    %c0_i32_0 = arith.constant 0 : i32
    return %c0_i32, %arg1 : i32, i32
  }
  func.func @transform_3(%arg0: i32, %arg1: i32) -> (i32, i32) {
    %c0_i32 = arith.constant 0 : i32
    %c0_i32_0 = arith.constant 0 : i32
    return %arg0, %c0_i32 : i32, i32
  }
  func.func @transform_4(%arg0: i32, %arg1: i32) -> (i32, i32) {
    %c0_i32 = arith.constant 0 : i32
    return %arg0, %arg1 : i32, i32
  }
  func.func @transform_5(%arg0: i32, %arg1: i32) -> (i32, i32, i32) {
    %c0_i32 = arith.constant 0 : i32
    %c0_i32_0 = arith.constant 0 : i32
    return %arg1, %arg0, %c0_i32 : i32, i32, i32
  }
}

</mosaic_0001>

<bundles_post_ra>
// kernel: tpu_custom_call.1
= control target key start
LH: loop header
LB: loop body
LE: loop exit
PB: predicated region body
PF: predicated region fallthrough
CT: control target
= control target key end

     0   :  { %11 = vsyncpa [#allocation3], 0  ;;  %s689_s0 = inlined_call_operand.hbm [shape: bf16[8,32], index: 0, kind: input, shape index: {}]   ;;  %s690_s1 = inlined_call_operand.hbm [shape: bf16[8,32], index: 1, kind: input, shape index: {}]   ;;  %s691_s2 = inlined_call_operand.hbm [shape: bf16[8,32], index: 2, kind: input, shape index: {}]   ;;  %s692_s3 = inlined_call_operand.vmem [shape: s8[8,8], index: 3, kind: input, shape index: {}]   ;;  %s693_s4 = inlined_call_operand.hbm [shape: f32[8,32], index: 4, kind: output, shape index: {0}]   ;;  %s694_s5 = inlined_call_operand.hbm [shape: bf16[4,8,8], index: 5, kind: output, shape index: {1}]  }
   0x1   :  { %12 = vsyncpa [#allocation6], 0 }
   0x2   :  { %13 = vsyncpa [#allocation4], 0  ;;  %s31_s20 = sshll.u32 %s690_s1, 4  ;;  %s32_s20 = int_to_ptr.hbm [resolvable:$true] %s31_s20 }
   0x3   :  { %14 = vsyncpa [#allocation10], 0  ;;  %s577_s21 = smov [#allocation5]   ;;  %s20_s25 = sshll.u32 %s689_s0, 4  ;;  %s21_s25 = int_to_ptr.hbm [resolvable:$true] %s20_s25 }
   0x4   :  { %s33_s22 = sshll.u32 %s577_s21, 4  ;;  %s578_s26 = smov [#allocation2]   ;;  %s34_s22 = int_to_ptr.vmem [resolvable:$true] %s33_s22 }
   0x5   :  { %36 = dma.hbm_to_vmem [thread:$0]  %s32_s20, 64, %s34_s22, [#allocation6]  }
   0x6   :  { %s22_s27 = sshll.u32 %s578_s26, 4  ;;  %s42_s30 = sshll.u32 %s691_s2, 4  ;;  %s23_s27 = int_to_ptr.vmem [resolvable:$true] %s22_s27  ;;  %s43_s30 = int_to_ptr.hbm [resolvable:$true] %s42_s30 }
   0x7   :  { %25 = dma.hbm_to_vmem [thread:$0]  %s21_s25, 64, %s23_s27, [#allocation3]  }
   0x8   :  { %s579_s1 = smov [#allocation7]  }
   0x9   :  { %s44_s6 = sshll.u32 %s579_s1, 4  ;;  %s45_s6 = int_to_ptr.vmem [resolvable:$true] %s44_s6 }
   0xa   :  { %47 = dma.hbm_to_vmem [thread:$0]  %s43_s30, 64, %s45_s6, [#allocation6]  }
   0xb   :  { %569 = dma.done.wait [#allocation3], 64  }
   0xc   :  { %570 = vsyncadd [#allocation3], 4294967232 }
   0xd   :  { %571 = dma.done.wait [#allocation6], 128  }
   0xe   :  { %572 = vsyncadd [#allocation6], 4294967168  ;;  %vm70_vm0 = vcmask 64512   ;;  %v68_v0 = vld [vmem:[#allocation5] sm:$0xf]  ;;  %s580_s0 = smov 120  }
   0xf   :  { %v135_v1 = vld [vmem:[#allocation5] sm:$0xf]  ;;  %v75_v2 = vsel %vm70_vm0, %v68_v0, 0  ;;  %v67_v5 = vld [vmem:[#allocation2] sm:$0xf]  ;;  %s581_s2 = smov 104  }
  0x10   :  { %v143_v3 = vunpack.c.l.b16 %v135_v1  ;;  %84 = vmatpush.bf16.xpose.msra.mxu0 %v75_v2  ;;  %v138_v6 = vunpack.c.l.b16 %v67_v5  ;;  %v217_v8 = vld [vmem:[#allocation5] sm:$0xf]  ;;  %s582_s7 = smov 112   ;;  %v65_v13 = vld [vmem:[%s692_s3] sm:$0x3]  ;;  %v583_v17 = vmov 0  }
  0x11   :  { %v222_v9 = vunpack.c.l.b16 %v217_v8  ;;  %v296_v10 = vld [vmem:[#allocation5] sm:$0xf]  ;;  %vm66_vm1 = vnez %v65_v13  ;;  %v69_v43 = vld [vmem:[#allocation7] sm:$0xf]  ;;  %vm117_vm3 = vcmask 1043456   ;;  %vm112_vm4 = vcmask 60416  }
  0x12   :  { %v144_v4 = vpack.c.b16 %v143_v3, %v143_v3  ;;  %v139_v7 = vpack.c.b16 %v138_v6, %v138_v6  ;;  %v301_v12 = vunpack.c.l.b16 %v296_v10  ;;  %v90_v18 = vsel %vm66_vm1, 16843009, %v583_v17  ;;  %v136_v1 = vld [vmem:[#allocation7] sm:$0xf]  ;;  %s584_s3 = smov 8   ;;  %s585_s10 = smov 16  }
  0x13   :  { %v223_v11 = vpack.c.b16 %v222_v9, %v222_v9  ;;  %v91_v20 = vunpack.c.0.s8 %v90_v18  ;;  %v119_v44 = vsel %vm117_vm3, %v69_v43, 0  ;;  %v188_v2 = vunpack.c.l.b16 %v136_v1  ;;  %s586_s11 = smov [#allocation9]   ;;  %s392_s15 = sshll.u32 %s694_s5, 4  ;;  %s393_s15 = int_to_ptr.hbm [resolvable:$true] %s392_s15 }
  0x14   :  { %145 = vrot.lane.b32.xlu1 %v144_v4, %s580_s0  ;;  %v302_v15 = vpack.c.b16 %v301_v12, %v301_v12  ;;  %128 = vmatpush.bf16.msra.mxu1 %v119_v44  ;;  %vm215_vm5 = vcmask 130112   ;;  %s390_s12 = sshll.u32 %s586_s11, 4  ;;  %s587_s16 = smov 64   ;;  %vm294_vm6 = vcmask 195712   ;;  %vm373_vm7 = vcmask 261312   ;;  %s391_s12 = int_to_ptr.vmem [resolvable:$true] %s390_s12 }
  0x15   :  { %224 = vrot.lane.b32.xlu2 %v223_v11, %s582_s7  ;;  %vm642_vm2 = vcmp.ne.s32.totalorder %v91_v20, 0  ;;  %v189_v4 = vpack.c.b16 %v188_v2, %v188_v2  ;;  %s588_s17 = smov 4   ;;  %s589_s18 = smov 24  }
  0x16   :  { %s590_s19 = smov [#allocation8]   ;;  %s382_s23 = sshll.u32 %s693_s4, 4  ;;  %s383_s23 = int_to_ptr.hbm [resolvable:$true] %s382_s23 }
  0x17   :  { %411 = vmatmul.msk.bf16.vlgmr.msra.gmra.mxu0 %vm70_vm0, %v67_v5  ;;  %s380_s20 = sshll.u32 %s590_s19, 4  ;;  %s381_s20 = int_to_ptr.vmem [resolvable:$true] %s380_s20 }
  0x1c   :  { %140 = vrot.lane.b32.xlu1 %v139_v7, %s580_s0 }
  0x1d   :  { %303 = vrot.lane.b32.xlu2 %v302_v15, %s581_s2 }
  0x24   :  { %298 = vrot.lane.b32.xlu1 %v139_v7, %s581_s2 }
  0x6f   :  { %v225_v26 = vpop.permute.xlu2 %224 }
  0x70   :  { %v230_v45 = vsel %vm70_vm0, %v225_v26, 0 }
  0x71   :  { %239 = vmatpush.bf16.xpose.msrb.mxu1 %v230_v45 }
  0x77   :  { %v304_v27 = vpop.permute.xlu2 %303 }
  0x78   :  { %v309_v28 = vsel %vm70_vm0, %v304_v27, 0 }
  0x79   :  { %318 = vmatpush.bf16.xpose.msrb.mxu0 %v309_v28 }
  0x86   :  { %v146_v14 = vpop.permute.xlu1 %145 }
  0x87   :  { %v151_v16 = vsel %vm70_vm0, %v146_v14, 0 }
  0x88   :  { %160 = vmatpush.bf16.xpose.msra.mxu2 %v151_v16 }
  0x8e   :  { %v141_v19 = vpop.permute.xlu1 %140 }
  0x8f   :  { %413 = vmatmul.msk.bf16.vlgmr.msra.gmra.mxu2 %vm70_vm0, %v141_v19 }
  0x94   :  { %v86_v22 = vpop.f32.mrf.mxu0 }
  0x95   :  { %v93_v23 = vsel %vm642_vm2, -1e+09, %v86_v22 }
  0x96   :  { %v94_v24 = vsel %vm70_vm0, %v93_v23, -inf  ;;  %v299_v32 = vpop.permute.xlu1 %298 }
  0x97   :  { %95 = vmax.xlane.f32.xlu0 %v94_v24  ;;  %417 = vmatmul.msk.bf16.vlgmr.msrb.gmra.mxu0 %vm70_vm0, %v299_v32 }
  0x9c   :  { %v88_v25 = vpop.f32.mrf.mxu0 }
 0x10a   :  { %v96_v29 = vpop.xlane.xlu0 %95 }
 0x10b   :  { %v97_v30 = vsub.f32 %v93_v23, %v96_v29  ;;  %v218_v29 = vld [vmem:[#allocation7] sm:$0xf] }
 0x10d   :  { %v98_v31 = vpack.c.bf16 %v97_v30, %v97_v30  ;;  %v267_v30 = vunpack.c.l.b16 %v218_v29 }
 0x10f   :  { %v99_v33 = vunpack.c.l.bf16 %v98_v31  ;;  %v268_v31 = vpack.c.b16 %v267_v30, %v267_v30 }
 0x111   :  { %v100_v34 = vmul.f32 1.442695, %v99_v33 }
 0x112   :  { %v162_v35 = vpop.f32.mrf.mxu2 }
 0x113   :  { %v166_v36 = vsel %vm642_vm2, -1e+09, %v162_v35  ;;  %433 = vpow2.f32 %v100_v34 }
 0x114   :  { %v167_v37 = vsel %vm70_vm0, %v166_v36, -inf  ;;  %v320_v50 = vpop.f32.mrf.mxu0 }
 0x115   :  { %168 = vmax.xlane.f32.xlu2 %v167_v37  ;;  %v324_v52 = vsel %vm642_vm2, -1e+09, %v320_v50 }
 0x116   :  { %v325_v53 = vsel %vm70_vm0, %v324_v52, -inf }
 0x119   :  { %v434_v38 = vpop.eup %433 }
 0x11a   :  { %v164_v39 = vpop.f32.mrf.mxu2  ;;  %v102_v40 = vpack.c.bf16 %v434_v38, %v434_v38 }
 0x11c   :  { %v103_v41 = vunpack.c.l.bf16 %v102_v40  ;;  %v322_v55 = vpop.f32.mrf.mxu0 }
 0x11e   :  { %v104_v42 = vsel %vm70_vm0, %v103_v41, 0.0 }
 0x11f   :  { %105 = vadd.xlane.f32.xlu0 %v104_v42 }
 0x133   :  { %219 = vrot.lane.b32.xlu0 %v139_v7, %s582_s7 }
 0x15d   :  { %326 = vmax.xlane.f32.xlu0 %v325_v53 }
 0x171   :  { %269 = vrot.lane.b32.xlu0 %v268_v31, %s582_s7 }
 0x188   :  { %v169_v46 = vpop.xlane.xlu2 %168 }
 0x189   :  { %v170_v47 = vsub.f32 %v166_v36, %v169_v46 }
 0x18b   :  { %v171_v48 = vpack.c.bf16 %v170_v47, %v170_v47 }
 0x18d   :  { %v172_v49 = vunpack.c.l.bf16 %v171_v48  ;;  %v297_v48 = vld [vmem:[#allocation7] sm:$0xf] }
 0x18f   :  { %v173_v51 = vmul.f32 1.442695, %v172_v49  ;;  %v346_v49 = vunpack.c.l.b16 %v297_v48 }
 0x191   :  { %435 = vpow2.f32 %v173_v51  ;;  %v347_v50 = vpack.c.b16 %v346_v49, %v346_v49 }
 0x192   :  { %v106_v54 = vpop.xlane.xlu0 %105 }
 0x193   :  { %437 = vrcp.f32 %v106_v54 }
 0x197   :  { %v436_v56 = vpop.eup %435 }
 0x198   :  { %v175_v57 = vpack.c.bf16 %v436_v56, %v436_v56 }
 0x199   :  { %v438_v58 = vpop.eup %437 }
 0x19a   :  { %v176_v59 = vunpack.c.l.bf16 %v175_v57  ;;  %v108_v60 = vpack.c.bf16 %v438_v58, %v438_v58 }
 0x19c   :  { %v177_v61 = vsel %vm70_vm0, %v176_v59, 0.0  ;;  %v109_v62 = vunpack.c.l.bf16 %v108_v60 }
 0x19d   :  { %178 = vadd.xlane.f32.xlu2 %v177_v61 }
 0x19e   :  { %v110_v63 = vmul.f32 %v109_v62, %v103_v41 }
 0x1a0   :  { %v111_v0 = vpack.c.bf16 %v110_v63, %v110_v63 }
 0x1a2   :  { %113 = vst.msk [vmem:[#allocation9] sm:$0xf] %vm112_vm4, %v111_v0  ;;  %412 = vmatmul.msk.bf16.vlgmr.msra.gmra.mxu1 %vm70_vm0, %v111_v0 }
 0x1a5   :  { %v220_v3 = vpop.permute.xlu0 %219 }
 0x1b2   :  { %415 = vmatmul.msk.bf16.vlgmr.msrb.gmra.mxu1 %vm70_vm0, %v220_v3 }
 0x1b5   :  { %190 = vrot.lane.b32.xlu2 %v189_v4, %s580_s0 }
 0x1d0   :  { %v327_v6 = vpop.xlane.xlu0 %326 }
 0x1d1   :  { %v328_v8 = vsub.f32 %v324_v52, %v327_v6 }
 0x1d3   :  { %v329_v13 = vpack.c.bf16 %v328_v8, %v328_v8 }
 0x1d5   :  { %v330_v16 = vunpack.c.l.bf16 %v329_v13 }
 0x1d7   :  { %v331_v18 = vmul.f32 1.442695, %v330_v16 }
 0x1e3   :  { %v270_v52 = vpop.permute.xlu0 %269 }
 0x1e4   :  { %v275_v53 = vsel %vm117_vm3, %v270_v52, 0 }
 0x210   :  { %v179_v5 = vpop.xlane.xlu2 %178 }
 0x211   :  { %439 = vrcp.f32 %v179_v5 }
 0x212   :  { %441 = vpow2.f32 %v331_v18 }
 0x217   :  { %v440_v7 = vpop.eup %439 }
 0x218   :  { %v181_v9 = vpack.c.bf16 %v440_v7, %v440_v7  ;;  %v191_v10 = vpop.permute.xlu2 %190  ;;  %v442_v20 = vpop.eup %441 }
 0x219   :  { %v196_v11 = vsel %vm117_vm3, %v191_v10, 0  ;;  %v333_v23 = vpack.c.bf16 %v442_v20, %v442_v20 }
 0x21a   :  { %v182_v12 = vunpack.c.l.bf16 %v181_v9  ;;  %205 = vmatpush.bf16.msra.mxu3 %v196_v11 }
 0x21b   :  { %v334_v26 = vunpack.c.l.bf16 %v333_v23 }
 0x21c   :  { %v183_v14 = vmul.f32 %v182_v12, %v176_v59 }
 0x21d   :  { %v335_v28 = vsel %vm70_vm0, %v334_v26, 0.0 }
 0x21e   :  { %v184_v15 = vpack.c.bf16 %v183_v14, %v183_v14  ;;  %284 = vmatpush.bf16.msrb.mxu3 %v275_v53 }
 0x21f   :  { %v130_v17 = vpop.f32.mrf.mxu1 }
 0x220   :  { %186 = vst.msk [vmem:[#allocation9 + $0x4] sm:$0xf] %vm112_vm4, %v184_v15  ;;  %414 = vmatmul.msk.bf16.vlgmr.msra.gmra.mxu3 %vm70_vm0, %v184_v15 }
 0x221   :  { %134 = vst.msk [vmem:[#allocation8] sm:$0xff] %vm70_vm0, %v130_v17 }
 0x227   :  { %v132_v19 = vpop.f32.mrf.mxu1 }
 0x22f   :  { %v241_v22 = vpop.f32.mrf.mxu1 }
 0x230   :  { %v245_v24 = vsel %vm642_vm2, -1e+09, %v241_v22 }
 0x231   :  { %v246_v25 = vsel %vm70_vm0, %v245_v24, -inf }
 0x232   :  { %247 = vmax.xlane.f32.xlu1 %v246_v25 }
 0x237   :  { %v243_v27 = vpop.f32.mrf.mxu1 }
 0x23a   :  { %336 = vadd.xlane.f32.xlu1 %v335_v28 }
 0x2a3   :  { %v207_v32 = vpop.f32.mrf.mxu3 }
 0x2a4   :  { %212 = vrot.lane.b32.xlu2 %v207_v32, %s584_s3 }
 0x2a5   :  { %v248_v33 = vpop.xlane.xlu1 %247 }
 0x2a6   :  { %v249_v34 = vsub.f32 %v245_v24, %v248_v33 }
 0x2a8   :  { %v250_v21 = vpack.c.bf16 %v249_v34, %v249_v34 }
 0x2aa   :  { %v251_v35 = vunpack.c.l.bf16 %v250_v21 }
 0x2ab   :  { %v209_v36 = vpop.f32.mrf.mxu3 }
 0x2ac   :  { %v252_v37 = vmul.f32 1.442695, %v251_v35 }
 0x2ad   :  { %v337_v38 = vpop.xlane.xlu1 %336 }
 0x2ae   :  { %443 = vpow2.f32 %v252_v37 }
 0x2af   :  { %445 = vrcp.f32 %v337_v38 }
 0x2b4   :  { %v444_v39 = vpop.eup %443 }
 0x2b5   :  { %v446_v40 = vpop.eup %445  ;;  %v254_v41 = vpack.c.bf16 %v444_v39, %v444_v39 }
 0x2b6   :  { %v339_v42 = vpack.c.bf16 %v446_v40, %v446_v40 }
 0x2b7   :  { %v255_v43 = vunpack.c.l.bf16 %v254_v41 }
 0x2b8   :  { %v340_v44 = vunpack.c.l.bf16 %v339_v42 }
 0x2b9   :  { %v256_v45 = vsel %vm70_vm0, %v255_v43, 0.0 }
 0x2ba   :  { %v341_v46 = vmul.f32 %v340_v44, %v334_v26  ;;  %257 = vadd.xlane.f32.xlu1 %v256_v45 }
 0x2bc   :  { %v342_v47 = vpack.c.bf16 %v341_v46, %v341_v46 }
 0x2be   :  { %344 = vst.msk [vmem:[#allocation9 + $0xc] sm:$0xf] %vm112_vm4, %v342_v47 }
 0x2d3   :  { %348 = vrot.lane.b32.xlu1 %v347_v50, %s581_s2 }
 0x2fe   :  { %v213_v51 = vpop.permute.xlu2 %212 }
 0x2ff   :  { %216 = vst.msk [vmem:[#allocation8] sm:$0xff] %vm215_vm5, %v213_v51 }
 0x32d   :  { %v258_v54 = vpop.xlane.xlu1 %257 }
 0x32e   :  { %447 = vrcp.f32 %v258_v54 }
 0x334   :  { %v448_v55 = vpop.eup %447 }
 0x335   :  { %v260_v56 = vpack.c.bf16 %v448_v55, %v448_v55 }
 0x337   :  { %v261_v57 = vunpack.c.l.bf16 %v260_v56 }
 0x339   :  { %v262_v58 = vmul.f32 %v261_v57, %v255_v43 }
 0x33b   :  { %v263_v59 = vpack.c.bf16 %v262_v58, %v262_v58 }
 0x33d   :  { %265 = vst.msk [vmem:[#allocation9 + $0x8] sm:$0xf] %vm112_vm4, %v263_v59  ;;  %416 = vmatmul.msk.bf16.vlgmr.msrb.gmra.mxu3 %vm70_vm0, %v263_v59 }
 0x33e   :  { %398 = dma.vmem_to_hbm [thread:$0]  %s391_s12, 256, %s393_s15, [#allocation10], %s587_s16, %s587_s16, %s588_s17  }
 0x345   :  { %v349_v60 = vpop.permute.xlu1 %348 }
 0x346   :  { %v354_v61 = vsel %vm117_vm3, %v349_v60, 0 }
 0x347   :  { %363 = vmatpush.bf16.msrb.mxu2 %v354_v61 }
 0x34a   :  { %418 = vmatmul.msk.bf16.vlgmr.msrb.gmra.mxu2 %vm70_vm0, %v342_v47 }
 0x3c0   :  { %v286_v62 = vpop.f32.mrf.mxu3 }
 0x3c1   :  { %291 = vrot.lane.b32.xlu2 %v286_v62, %s585_s10 }
 0x3c8   :  { %v288_v63 = vpop.f32.mrf.mxu3 }
 0x3cd   :  { %v365_v0 = vpop.f32.mrf.mxu2 }
 0x3ce   :  { %370 = vrot.lane.b32.xlu0 %v365_v0, %s589_s18 }
 0x3d5   :  { %v367_v1 = vpop.f32.mrf.mxu2 }
 0x41b   :  { %v292_v2 = vpop.permute.xlu2 %291 }
 0x41c   :  { %295 = vst.msk [vmem:[#allocation8] sm:$0xff] %vm294_vm6, %v292_v2 }
 0x440   :  { %v371_v3 = vpop.permute.xlu0 %370 }
 0x441   :  { %374 = vst.msk [vmem:[#allocation8] sm:$0xff] %vm373_vm7, %v371_v3 }
 0x442   :  { %385 = dma.vmem_to_hbm [thread:$0]  %s381_s20, 128, %s383_s23, [#allocation4]  }
 0x443   :  { %573 = dma.done.wait [#allocation4], 128  }
 0x444   :  { %574 = vsyncadd [#allocation4], 4294967168 }
 0x445   :  { %575 = dma.done.wait [#allocation10], 256  }
 0x446   :  { %576 = vsyncadd [#allocation10], 4294967040 }
 0x447   :  { %407 = vsyncpa [#allocation3], 1 }
 0x448   :  { %408 = vsyncpa [#allocation6], 1 }
 0x449   :  { %409 = vsyncpa [#allocation4], 1 }
 0x44a   :  { %410 = vsyncpa [#allocation10], 1 }

</bundles_post_ra>
